<compile_context>
chip_gen: v6e
topology: v6e:2x2x1
jax: 0.10.0
libtpu: 0.0.40
codegen_flags: <defaults>
</compile_context>

<pallas_src>
import functools

import jax
import jax.numpy as jnp
import numpy as np
from jax.experimental import pallas as pl
from jax.experimental.pallas import tpu as pltpu

NUM_BITS = 8
QMIN = 0.0                                # signed=False
QMAX = QMIN + 2.0 ** NUM_BITS - 1.0       # 255.0

_LANE = 128
_SUBLANE = 8
_VMEM_LIMIT = 32 * 1024 * 1024            # safe scoped-VMEM request on v5e/v6e/v7x


def _round_up(x, m):
    return ((x + m - 1) // m) * m


def _pick_row_tile(rows, row_bytes, target_bytes):
    """Row-tile: either the full (small) row count or a multiple of 8, never > rows."""
    if rows <= _SUBLANE:
        return rows
    tr = (target_bytes // max(row_bytes, 1)) // _SUBLANE * _SUBLANE
    return int(max(_SUBLANE, min(tr, (rows // _SUBLANE) * _SUBLANE)))


def _flat_view_shape(total):
    """Lane-dense (R, C) factorization of the flat element count (C multiple of 128)."""
    best = None
    for c in (1024, 512, 256, 128):
        if total % c == 0:
            if best is None:
                best = c
            if total // c >= _SUBLANE:       # prefer full sublanes too
                best = c
                break
    if best is None:
        return None                          # total not a multiple of 128
    return total // best, best


# ----------------------------------------------------------------------------------
# Fused kernel (small activations): qparams + fake-quant in one pass over x.
# ----------------------------------------------------------------------------------
def _fused_kernel(x_ref, o_ref, zp_ref, rng_ref):
    x = x_ref[...].astype(jnp.float32)                         # (N, F)
    row_min = jnp.min(x, axis=1, keepdims=True)                # (N, 1)
    row_max = jnp.max(x, axis=1, keepdims=True)
    min_v = jnp.minimum(jnp.mean(row_min), 0.0)                # mean of per-sample mins
    max_v = jnp.maximum(jnp.mean(row_max), 0.0)
    rng = max_v - min_v
    rng = jnp.where(rng == 0.0, jnp.float32(1.0), rng)         # range[range == 0] = 1
    scale = jnp.clip(rng, 1e-6, 1e5) / (QMAX - QMIN)
    inv_scale = 1.0 / scale                                    # scalar, computed once
    q = jnp.round(jnp.clip((x - min_v) * inv_scale, QMIN, QMAX))
    o_ref[...] = (q * scale + min_v).astype(o_ref.dtype)
    zp_ref[...] = jnp.full((1, 1), min_v, jnp.float32)         # un-clipped qparams for EMA
    rng_ref[...] = jnp.full((1, 1), rng, jnp.float32)


def _fused_call(x2d):
    N, F = x2d.shape
    return pl.pallas_call(
        _fused_kernel,
        out_shape=(jax.ShapeDtypeStruct((N, F), x2d.dtype),
                   jax.ShapeDtypeStruct((1, 1), jnp.float32),
                   jax.ShapeDtypeStruct((1, 1), jnp.float32)),
        in_specs=[pl.BlockSpec((N, F), lambda: (0, 0))],
        out_specs=(pl.BlockSpec((N, F), lambda: (0, 0)),
                   pl.BlockSpec((1, 1), lambda: (0, 0)),
                   pl.BlockSpec((1, 1), lambda: (0, 0))),
        compiler_params=pltpu.CompilerParams(vmem_limit_bytes=_VMEM_LIMIT),
    )(x2d)


# ----------------------------------------------------------------------------------
# Tiled kernel 1 (large activations): streaming per-row min/max reduction.
#   grid = (row_blocks [parallel], col_blocks [arbitrary/reduction])
#   outputs (N,1) row_min/row_max act as resident accumulators across the col axis.
# ----------------------------------------------------------------------------------
def _row_minmax_kernel(x_ref, min_ref, max_ref, *, tile_f, f_valid, mask_cols):
    j = pl.program_id(1)
    x = x_ref[...].astype(jnp.float32)                        # (TN, TF)
    if mask_cols:
        # mask the padded columns of the trailing block with reduction-neutral values
        col = j * tile_f + jax.lax.broadcasted_iota(jnp.int32, x.shape, 1)
        valid = col < f_valid
        xmin = jnp.min(jnp.where(valid, x, jnp.inf), axis=1, keepdims=True)
        xmax = jnp.max(jnp.where(valid, x, -jnp.inf), axis=1, keepdims=True)
    else:
        xmin = jnp.min(x, axis=1, keepdims=True)
        xmax = jnp.max(x, axis=1, keepdims=True)

    @pl.when(j == 0)
    def _():
        min_ref[...] = xmin
        max_ref[...] = xmax

    @pl.when(j > 0)
    def _():
        min_ref[...] = jnp.minimum(min_ref[...], xmin)
        max_ref[...] = jnp.maximum(max_ref[...], xmax)


def _reduce_rowminmax(x2d, block_bytes):
    N, F = x2d.shape
    ib = x2d.dtype.itemsize
    TN = N if N <= _SUBLANE else int(min(_SUBLANE * 32, (N // _SUBLANE) * _SUBLANE))

    if F < _LANE:
        TF = F                                           # full (small) lane dim
    else:
        tf = (block_bytes // max(TN * ib, 1)) // _LANE * _LANE
        cap = F if F % _LANE == 0 else (F // _LANE) * _LANE   # never exceed array dim
        TF = int(max(_LANE, min(tf, cap)))
    mask_cols = (F % TF) != 0

    grid = (pl.cdiv(N, TN), pl.cdiv(F, TF))
    kernel = functools.partial(_row_minmax_kernel, tile_f=TF, f_valid=F,
                               mask_cols=mask_cols)
    return pl.pallas_call(
        kernel,
        out_shape=(jax.ShapeDtypeStruct((N, 1), jnp.float32),
                   jax.ShapeDtypeStruct((N, 1), jnp.float32)),
        grid=grid,
        in_specs=[pl.BlockSpec((TN, TF), lambda i, j: (i, j))],
        out_specs=(pl.BlockSpec((TN, 1), lambda i, j: (i, 0)),
                   pl.BlockSpec((TN, 1), lambda i, j: (i, 0))),
        compiler_params=pltpu.CompilerParams(
            dimension_semantics=("parallel", "arbitrary"),
            vmem_limit_bytes=_VMEM_LIMIT),
    )(x2d)


# ----------------------------------------------------------------------------------
# Tiled kernel 2 (large activations): elementwise fake-quantization.
#   scalars (zp, scale, inv_scale) arrive via SMEM; blocks are lane-dense.
# ----------------------------------------------------------------------------------
def _quantize_kernel(params_ref, x_ref, o_ref):
    zp = params_ref[0]          # zero_point (mean of per-sample mins, clamped <= 0)
    scale = params_ref[1]       # clamp(range,1e-6,1e5)/255, precomputed once in glue
    inv_scale = params_ref[2]
    x = x_ref[...].astype(jnp.float32)
    q = jnp.round(jnp.clip((x - zp) * inv_scale, QMIN, QMAX))
    o_ref[...] = (q * scale + zp).astype(o_ref.dtype)


def _quantize_call(x2d, params, block_bytes):
    N, F = x2d.shape
    ib = x2d.dtype.itemsize
    total = N * F
    view = _flat_view_shape(total)
    if view is not None:
        R, C = view
        x_view = x2d.reshape(R, C)          # free, lane-dense view of the flat buffer
        TC = C
    else:
        R, C = N, F                         # odd flatten size: keep (N, F) view
        x_view = x2d
        if C < _LANE:
            TC = C                          # full (small) lane dim
        else:
            TC = int(min((C // _LANE) * _LANE, 16 * _LANE))   # never exceeds C
    TR = _pick_row_tile(R, TC * ib, block_bytes)
    grid = (pl.cdiv(R, TR), pl.cdiv(C, TC))
    q = pl.pallas_call(
        _quantize_kernel,
        out_shape=jax.ShapeDtypeStruct((R, C), x2d.dtype),
        grid=grid,
        in_specs=[pl.BlockSpec(memory_space=pltpu.MemorySpace.SMEM),
                  pl.BlockSpec((TR, TC), lambda i, j: (i, j))],
        out_specs=pl.BlockSpec((TR, TC), lambda i, j: (i, j)),
        compiler_params=pltpu.CompilerParams(
            dimension_semantics=("parallel", "parallel"),
            vmem_limit_bytes=_VMEM_LIMIT),
    )(params, x_view)
    return q.reshape(N, F)


# ----------------------------------------------------------------------------------
# Wrapper: equivalent of QuantMeasure.forward in training mode (measure=False).
# ----------------------------------------------------------------------------------
@functools.partial(jax.jit, static_argnames=("momentum", "fuse_vmem_bytes",
                                             "reduce_block_bytes", "quant_block_bytes"))
def quant_measure_forward(x, running_zero_point, running_range, *,
                          momentum=0.1,
                          fuse_vmem_bytes=4 * 1024 * 1024,
                          reduce_block_bytes=2 * 1024 * 1024,
                          quant_block_bytes=4 * 1024 * 1024):
    """Returns (q_x, new_running_zero_point, new_running_range)."""
    orig_shape = x.shape
    N = x.shape[0]
    F = int(np.prod(x.shape[1:])) if len(x.shape) > 1 else 1
    x2d = x.reshape(N, F)                   # keep input dtype; no wrapper-side f32 copy

    if N * F * 4 <= fuse_vmem_bytes:
        # small activation: single fused pass (x read once, written once)
        q2d, zp11, rng11 = _fused_call(x2d)
        zp = zp11[0, 0]
        rng = rng11[0, 0]
    else:
        # large activation: streaming reduction, scalar glue, tiled lane-dense quantize
        row_min, row_max = _reduce_rowminmax(x2d, reduce_block_bytes)
        zp = jnp.minimum(jnp.mean(row_min), 0.0)               # min_values[>0] = 0
        max_v = jnp.maximum(jnp.mean(row_max), 0.0)            # max_values[<0] = 0
        rng = max_v - zp
        rng = jnp.where(rng == 0.0, jnp.float32(1.0), rng)     # range[range == 0] = 1
        scale = jnp.clip(rng, 1e-6, 1e5) / (QMAX - QMIN)
        params = jnp.stack([zp, scale, 1.0 / scale]).astype(jnp.float32)
        q2d = _quantize_call(x2d, params, quant_block_bytes)

    # running-buffer EMA update (torch.no_grad block); fuses into one tiny op under jit.
    new_rzp = running_zero_point * momentum + zp * (1.0 - momentum)
    new_rr = running_range * momentum + rng * (1.0 - momentum)
    return q2d.reshape(orig_shape), new_rzp, new_rr


# ----------------------------------------------------------------------------------
# Pure-jnp reference (same math; uses inv_scale multiply, which matches the PyTorch
# divide up to 1 ulp before rounding).
# ----------------------------------------------------------------------------------
def _reference(x, rzp, rr, momentum=0.1):
    N = x.shape[0]
    xf = x.reshape(N, -1).astype(jnp.float32)
    mn = jnp.minimum(jnp.mean(jnp.min(xf, axis=1)), 0.0)
    mx = jnp.maximum(jnp.mean(jnp.max(xf, axis=1)), 0.0)
    rng = mx - mn
    rng = jnp.where(rng == 0.0, jnp.float32(1.0), rng)
    scale = jnp.clip(rng, 1e-6, 1e5) / (QMAX - QMIN)
    inv_scale = 1.0 / scale
    q = jnp.round(jnp.clip((xf - mn) * inv_scale, QMIN, QMAX))
    out = (q * scale + mn).astype(x.dtype).reshape(x.shape)
    new_rzp = rzp * momentum + mn * (1.0 - momentum)
    new_rr = rr * momentum + rng * (1.0 - momentum)
    return out, new_rzp, new_rr


def _check(x, rzp, rr, **kw):
    q, nrzp, nrr = quant_measure_forward(x, rzp, rr, **kw)
    q = jax.block_until_ready(q)
    rq, rrzp, rrr = _reference(x, rzp, rr)

    # one quantization step, used as a tolerance unit for rare rounding-tie elements
    xf = np.asarray(x, np.float64).reshape(x.shape[0], -1)
    mn = min(float(np.mean(xf.min(axis=1))), 0.0)
    mx = max(float(np.mean(xf.max(axis=1))), 0.0)
    rng = (mx - mn) if (mx - mn) != 0.0 else 1.0
    step = float(np.clip(rng, 1e-6, 1e5)) / (QMAX - QMIN)

    diff = np.abs(np.asarray(q, np.float64) - np.asarray(rq, np.float64))
    assert diff.max() <= step * 1.001 + 1e-5, \
        f"fake-quant mismatch: {diff.max()} (step={step})"
    assert np.mean(diff > 0.5 * step) <= 5e-3, "too many rounding-boundary mismatches"
    assert np.allclose(np.asarray(nrzp), np.asarray(rrzp), atol=1e-5)
    assert np.allclose(np.asarray(nrr), np.asarray(rrr), atol=1e-5)


if __name__ == "__main__":
    # buffers from __init__: shape_measure=(1,), initialized to zeros
    rzp0 = jnp.zeros((1,), jnp.float32)
    rr0 = jnp.zeros((1,), jnp.float32)

    # NCHW activation like the PyTorch module (batch=2, channels=4, spatial=16)
    x1 = jax.random.normal(jax.random.PRNGKey(0), (2, 4, 16, 16), dtype=jnp.float32)
    _check(x1, rzp0, rr0)                                     # fused single-pass path
    _check(x1, rzp0, rr0, fuse_vmem_bytes=0,                  # force tiled streaming path
           reduce_block_bytes=4096, quant_block_bytes=4096)

    # flatten size not a multiple of 128 -> exercises full-dim (non-128) edge blocks
    x2 = jax.random.normal(jax.random.PRNGKey(1), (2, 3, 5, 7), dtype=jnp.float32)
    _check(x2, rzp0, rr0)
    _check(x2, rzp0, rr0, fuse_vmem_bytes=0,
           reduce_block_bytes=4096, quant_block_bytes=4096)

    # larger batch -> multi-block accumulation + multi-block lane-dense quantize
    x3 = jax.random.normal(jax.random.PRNGKey(2), (16, 8, 16, 16), dtype=jnp.float32)
    _check(x3, rzp0, rr0, fuse_vmem_bytes=0,
           reduce_block_bytes=8192, quant_block_bytes=8192)

    print("KERNEL_OK")
</pallas_src>

<mosaic_0001>
module attributes {stable_mosaic.version = 11 : i64} {
  func.func @_fused_kernel(%arg0: memref<2x1024xf32, #tpu.memory_space<vmem>>, %arg1: memref<2x1024xf32, #tpu.memory_space<vmem>>, %arg2: memref<1x1xf32, #tpu.memory_space<vmem>>, %arg3: memref<1x1xf32, #tpu.memory_space<vmem>>) attributes {dimension_semantics = [], scalar_prefetch = 0 : i64, scratch_operands = 0 : i64, tpu.core_type = #tpu.core_type<tc>} {
    %c0 = arith.constant 0 : index
    %c0_0 = arith.constant 0 : index
    %0 = vector.load %arg0[%c0, %c0_0] : memref<2x1024xf32, #tpu.memory_space<vmem>>, vector<2x1024xf32>
    %cst = arith.constant dense<0x7F800000> : vector<2xf32>
    %1 = vector.multi_reduction <minimumf>, %0, %cst [1] : vector<2x1024xf32> to vector<2xf32>
    %2 = vector.shape_cast %1 : vector<2xf32> to vector<2x1xf32>
    %cst_1 = arith.constant dense<0xFF800000> : vector<2xf32>
    %3 = vector.multi_reduction <maximumf>, %0, %cst_1 [1] : vector<2x1024xf32> to vector<2xf32>
    %4 = vector.shape_cast %3 : vector<2xf32> to vector<2x1xf32>
    %5 = vector.shape_cast %2 : vector<2x1xf32> to vector<1x2x1xf32>
    %cst_2 = arith.constant dense<0.000000e+00> : vector<1xf32>
    %6 = vector.multi_reduction <add>, %5, %cst_2 [1, 2] : vector<1x2x1xf32> to vector<1xf32>
    %7 = vector.shape_cast %6 : vector<1xf32> to vector<1x1x1xf32>
    %8 = vector.extract %7[0, 0, 0] : f32 from vector<1x1x1xf32>
    %cst_3 = arith.constant 2.000000e+00 : f32
    %9 = arith.divf %8, %cst_3 : f32
    %cst_4 = arith.constant 0.000000e+00 : f32
    %10 = arith.minimumf %9, %cst_4 : f32
    %11 = vector.shape_cast %4 : vector<2x1xf32> to vector<1x2x1xf32>
    %cst_5 = arith.constant dense<0.000000e+00> : vector<1xf32>
    %12 = vector.multi_reduction <add>, %11, %cst_5 [1, 2] : vector<1x2x1xf32> to vector<1xf32>
    %13 = vector.shape_cast %12 : vector<1xf32> to vector<1x1x1xf32>
    %14 = vector.extract %13[0, 0, 0] : f32 from vector<1x1x1xf32>
    %cst_6 = arith.constant 2.000000e+00 : f32
    %15 = arith.divf %14, %cst_6 : f32
    %cst_7 = arith.constant 0.000000e+00 : f32
    %16 = arith.maximumf %15, %cst_7 : f32
    %17 = arith.subf %16, %10 : f32
    %cst_8 = arith.constant 0.000000e+00 : f32
    %18 = arith.cmpf oeq, %17, %cst_8 : f32
    %cst_9 = arith.constant 1.000000e+00 : f32
    %19 = arith.select %18, %cst_9, %17 : f32
    %cst_10 = arith.constant 9.99999997E-7 : f32
    %cst_11 = arith.constant 1.000000e+05 : f32
    %20 = arith.maximumf %cst_10, %19 : f32
    %21 = arith.minimumf %cst_11, %20 : f32
    %cst_12 = arith.constant 2.550000e+02 : f32
    %22 = arith.divf %21, %cst_12 : f32
    %cst_13 = arith.constant 1.000000e+00 : f32
    %23 = arith.divf %cst_13, %22 : f32
    %24 = vector.broadcast %10 : f32 to vector<2x1024xf32>
    %25 = arith.subf %0, %24 : vector<2x1024xf32>
    %26 = vector.broadcast %23 : f32 to vector<2x1024xf32>
    %27 = arith.mulf %25, %26 : vector<2x1024xf32>
    %cst_14 = arith.constant 0.000000e+00 : f32
    %cst_15 = arith.constant 2.550000e+02 : f32
    %28 = vector.broadcast %cst_14 : f32 to vector<2x1024xf32>
    %29 = arith.maximumf %28, %27 : vector<2x1024xf32>
    %30 = vector.broadcast %cst_15 : f32 to vector<2x1024xf32>
    %31 = arith.minimumf %30, %29 : vector<2x1024xf32>
    %32 = math.roundeven %31 : vector<2x1024xf32>
    %33 = vector.broadcast %22 : f32 to vector<2x1024xf32>
    %34 = arith.mulf %32, %33 : vector<2x1024xf32>
    %35 = vector.broadcast %10 : f32 to vector<2x1024xf32>
    %36 = arith.addf %34, %35 : vector<2x1024xf32>
    %c0_16 = arith.constant 0 : index
    %c0_17 = arith.constant 0 : index
    %37 = vector.load %arg1[%c0_16, %c0_17] : memref<2x1024xf32, #tpu.memory_space<vmem>>, vector<2x1024xf32>
    tpu.vector_store %arg1[%c0_16, %c0_17], %36 {strides = array<i32>} : memref<2x1024xf32, #tpu.memory_space<vmem>>, vector<2x1024xf32>,
    %38 = vector.broadcast %10 : f32 to vector<1x1xf32>
    %c0_18 = arith.constant 0 : index
    %c0_19 = arith.constant 0 : index
    %39 = vector.load %arg2[%c0_18, %c0_19] : memref<1x1xf32, #tpu.memory_space<vmem>>, vector<1x1xf32>
    tpu.vector_store %arg2[%c0_18, %c0_19], %38 {strides = array<i32>} : memref<1x1xf32, #tpu.memory_space<vmem>>, vector<1x1xf32>,
    %40 = vector.broadcast %19 : f32 to vector<1x1xf32>
    %c0_20 = arith.constant 0 : index
    %c0_21 = arith.constant 0 : index
    %41 = vector.load %arg3[%c0_20, %c0_21] : memref<1x1xf32, #tpu.memory_space<vmem>>, vector<1x1xf32>
    tpu.vector_store %arg3[%c0_20, %c0_21], %40 {strides = array<i32>} : memref<1x1xf32, #tpu.memory_space<vmem>>, vector<1x1xf32>,
    return
  }
}

</mosaic_0001>

<bundles_post_ra>
// kernel: quant_measure_forward.1
= control target key start
LH: loop header
LB: loop body
LE: loop exit
PB: predicated region body
PF: predicated region fallthrough
CT: control target
= control target key end

     0   :  { %9 = vsyncpa [#allocation3], 0  ;;  %v21_v2 = vlaneseq  ;;  %v265_v3 = vmov 1983009808   ;;  %s346_s0 = inlined_call_operand.vmem [shape: f32[2,1024], index: 0, kind: input, shape index: {}]   ;;  %s347_s1 = inlined_call_operand.vmem [shape: f32[2,1024], index: 1, kind: output, shape index: {0}]   ;;  %s348_s2 = inlined_call_operand.hbm [shape: f32[1,1], index: 2, kind: output, shape index: {1}]   ;;  %s349_s3 = inlined_call_operand.hbm [shape: f32[1,1], index: 3, kind: output, shape index: {2}]  }
   0x1   :  { %v294_v0 = vld [vmem:[%s346_s0] sm:$0xff]  ;;  %v299_v1 = vld [vmem:[%s346_s0 + $0x8] sm:$0xff]  ;;  %v19_v4 = vunpack.c.l.s4 %v265_v3 }
   0x2   :  { %10 = vsyncpa [#allocation5], 0  ;;  %v22_v5 = vshrl.u32 %v21_v2, 7  ;;  %v17_v6 = vcombine.high %v294_v0, %v294_v0  ;;  %v34_v8 = vcombine.high %v299_v1, %v299_v1  ;;  %vm59_vm0 = vcmask 1041408   ;;  %s266_s16 = smov [#allocation2]   ;;  %s267_s19 = smov 0.0  }
   0x3   :  { %v20_v7 = vunpack.c.0.s8 %v19_v4  ;;  %vm94_vm1 = vcmask 1024   ;;  %s165_s17 = sshll.u32 %s266_s16, 4  ;;  %vm153_vm2 = vcmask 0   ;;  %s166_s17 = int_to_ptr.vmem [resolvable:$true] %s165_s17 }
   0x4   :  { %s221_s23 = scalar_lea.vmem %s166_s17, 16  ;;  %s225_s24 = scalar_lea.vmem %s166_s17, 32 }
   0x5   :  { %v23_v9 = vsub.s32 %v20_v7, %v22_v5  ;;  %p222_p0 = scmp.ne.s32.totalorder %s166_s17, %s221_s23  ;;  %p226_p1 = scmp.lt.s32.totalorder %s166_s17, %s166_s17 }
   0x6   :  { %p227_p2 = scmp.lt.s32.totalorder %s225_s24, %s221_s23 }
   0x7   :  { %v24_v10 = vrot.slane %v294_v0, %v23_v9  ;;  %v31_v11 = vrot.slane %v17_v6, %v23_v9  ;;  %v41_v12 = vrot.slane %v299_v1, %v23_v9  ;;  %v48_v13 = vrot.slane %v34_v8, %v23_v9 }
   0x8   :  { %p228_p3 = por %p227_p2, %p226_p1 }
   0x9   :  { %v32_v14 = vcombine.high %v24_v10, %v24_v10  ;;  %v33_v15 = vcombine.high %v31_v11, %v31_v11  ;;  %v49_v16 = vcombine.high %v41_v12, %v41_v12  ;;  %v50_v17 = vcombine.high %v48_v13, %v48_v13 }
   0xa   :  { %v60_v18 = vsel %vm59_vm0, %v24_v10, inf  ;;  %v62_v19 = vsel %vm59_vm0, %v31_v11, inf  ;;  %v64_v20 = vsel %vm59_vm0, %v41_v12, inf  ;;  %v68_v21 = vsel %vm59_vm0, %v48_v13, inf  ;;  %p229_p4 = pnand %p228_p3, %p222_p0 }
   0xb   :  { %v61_v22 = vsel %vm59_vm0, %v32_v14, inf  ;;  %v63_v23 = vsel %vm59_vm0, %v33_v15, inf  ;;  %v65_v24 = vmin.f32 %v60_v18, %v64_v20  ;;  %v66_v25 = vsel %vm59_vm0, %v49_v16, inf }
   0xc   :  { %v67_v26 = vmin.f32 %v61_v22, %v66_v25  ;;  %v69_v27 = vmin.f32 %v62_v19, %v68_v21  ;;  %v70_v28 = vsel %vm59_vm0, %v50_v17, inf  ;;  %v77_v29 = vsel %vm59_vm0, %v24_v10, -inf }
   0xd   :  { %v71_v30 = vmin.f32 %v63_v23, %v70_v28  ;;  %v78_v31 = vsel %vm59_vm0, %v32_v14, -inf  ;;  %v79_v32 = vsel %vm59_vm0, %v31_v11, -inf  ;;  %v80_v33 = vsel %vm59_vm0, %v33_v15, -inf }
   0xe   :  { %v72_v34 = vmin.f32 %v65_v24, %v67_v26  ;;  %v81_v35 = vsel %vm59_vm0, %v41_v12, -inf  ;;  %v83_v36 = vsel %vm59_vm0, %v49_v16, -inf  ;;  %v85_v37 = vsel %vm59_vm0, %v48_v13, -inf }
   0xf   :  { %v73_v38 = vmin.f32 %v69_v27, %v71_v30  ;;  %v82_v39 = vmax.f32 %v77_v29, %v81_v35  ;;  %v84_v40 = vmax.f32 %v78_v31, %v83_v36  ;;  %v86_v41 = vmax.f32 %v79_v32, %v85_v37 }
  0x10   :  { %v87_v42 = vsel %vm59_vm0, %v50_v17, -inf }
  0x11   :  { %v74_v43 = vmin.f32 %v72_v34, %v73_v38  ;;  %v88_v44 = vmax.f32 %v80_v33, %v87_v42  ;;  %v89_v45 = vmax.f32 %v82_v39, %v84_v40 }
  0x13   :  { %75 = vmin.xlane.f32.xlu0 %v74_v43  ;;  %v90_v46 = vmax.f32 %v86_v41, %v88_v44 }
  0x15   :  { %v91_v47 = vmax.f32 %v89_v45, %v90_v46 }
  0x17   :  { %92 = vmax.xlane.f32.xlu0 %v91_v47 }
  0x9c   :  { %v76_v48 = vpop.xlane.xlu0 %75 }
  0x9d   :  { %v95_v49 = vsel %vm94_vm1, %v76_v48, 0.0 }
  0x9e   :  { %96 = vadd.xlane.f32.xlu1 %v95_v49 }
  0xa0   :  { %v93_v50 = vpop.xlane.xlu0 %92 }
  0xa1   :  { %v109_v51 = vsel %vm94_vm1, %v93_v50, 0.0 }
  0xa2   :  { %110 = vadd.xlane.f32.xlu1 %v109_v51 }
 0x127   :  { %v97_v52 = vpop.xlane.xlu1 %96 }
 0x128   :  { %v98_v53 = vrot.slane %v97_v52, 4 }
 0x12a   :  { %v99_v54 = vadd.f32 %v98_v53, %v97_v52 }
 0x12b   :  { %v111_v55 = vpop.xlane.xlu1 %110 }
 0x12c   :  { %v100_v56 = vrot.slane %v99_v54, 2  ;;  %v112_v57 = vrot.slane %v111_v55, 4 }
 0x12e   :  { %v113_v58 = vadd.f32 %v112_v57, %v111_v55  ;;  %v101_v59 = vadd.f32 %v100_v56, %v99_v54 }
 0x130   :  { %v114_v60 = vrot.slane %v113_v58, 2  ;;  %v102_v61 = vrot.slane %v101_v59, 1 }
 0x132   :  { %v115_v62 = vadd.f32 %v114_v60, %v113_v58  ;;  %v103_v63 = vadd.f32 %v102_v61, %v101_v59 }
 0x134   :  { %189 = vpush %v103_v63  ;;  %v116_v2 = vrot.slane %v115_v62, 1 }
 0x136   :  { %v117_v3 = vadd.f32 %v116_v2, %v115_v62 }
 0x138   :  { %191 = vpush %v117_v3 }
 0x165   :  { %s190_s0 = spop %189 }
 0x166   :  { %s107_s18 = smul.f32 0.5, %s190_s0 }
 0x168   :  { %s108_s20 = smin.f32 %s267_s19, %s107_s18 }
 0x169   :  { %v323_v4 = vstv %s108_s20  ;;  %s192_s21 = spop %191 }
 0x16a   :  { %s121_s22 = smul.f32 0.5, %s192_s21  ;;  %154 = vst.msk [vmem:[#allocation2] sm:$0x1] %vm153_vm2, %v323_v4 }
 0x16b   :  { %232 = shalt.err (!%p229_p4)
}
 0x16c   :  { %168 = dma.vmem_to_hbm [thread:$0]  %s166_s17, 16, %s348_s2, [#allocation3]  }
 0x16d   :  { %s122_s27 = smax.f32 %s267_s19, %s121_s22  ;;  %s268_s29 = smov [#allocation4]  }
 0x16e   :  { %s123_s28 = ssub.f32 %s122_s27, %s108_s20  ;;  %s175_s30 = sshll.u32 %s268_s29, 4  ;;  %s176_s30 = int_to_ptr.vmem [resolvable:$true] %s175_s30 }
 0x16f   :  { %s269_s4 = smov 1e-06   ;;  %s270_s6 = smov 100000.0  }
 0x170   :  { %p124_p5 = scmp.eq.f32.partialorder %s123_s28, 0.0  ;;  %s241_s9 = scalar_lea.vmem %s176_s30, 16 }
 0x171   :  { %p242_p6 = scmp.ne.s32.totalorder %s176_s30, %s241_s9  ;;  %s245_s10 = scalar_lea.vmem %s176_s30, 32 }
 0x172   :  { %s351_s28 = smov (%p124_p5, %s123_s28), 1.0  ;;  %p246_p7 = scmp.lt.s32.totalorder %s176_s30, %s176_s30 }
 0x173   :  { %s126_s5 = smax.f32 %s269_s4, %s351_s28  ;;  %v155_v5 = vstv %s351_s28  ;;  %p247_p8 = scmp.lt.s32.totalorder %s245_s10, %s241_s9 }
 0x174   :  { %s127_s7 = smin.f32 %s270_s6, %s126_s5  ;;  %156 = vst.msk [vmem:[#allocation4] sm:$0x1] %vm153_vm2, %v155_v5 }
 0x175   :  { %s130_s8 = smul.f32 0.003921569, %s127_s7  ;;  %p248_p9 = por %p247_p8, %p246_p7 }
 0x177   :  { %p249_p10 = pnand %p248_p9, %p242_p6 }
 0x179   :  { %252 = shalt.err (!%p249_p10)
}
 0x17a   :  { %178 = dma.vmem_to_hbm [thread:$0]  %s176_s30, 16, %s349_s3, [#allocation5]   ;;  %v131_v6 = vstv %s130_s8  ;;  %v135_v8 = vsub.f32 %v294_v0, %v323_v4  ;;  %v136_v9 = vsub.f32 %v299_v1, %v323_v4 }
 0x17b   :  { %219 = vrcp.f32 %v131_v6 }
 0x188   :  { %v220_v7 = vpop.eup %219 }
 0x189   :  { %193 = vpush %v220_v7 }
 0x1ba   :  { %s194_s12 = spop %193 }
 0x1bb   :  { %v137_v10 = vstv %s194_s12 }
 0x1bc   :  { %v138_v11 = vmul.f32 %v137_v10, %v135_v8  ;;  %v139_v12 = vmul.f32 %v137_v10, %v136_v9 }
 0x1be   :  { %v140_v13 = vmax.f32 %v138_v11, 0.0  ;;  %v141_v14 = vmax.f32 %v139_v12, 0.0 }
 0x1c0   :  { %v142_v15 = vmin.f32 %v140_v13, 255.0  ;;  %v143_v16 = vmin.f32 %v141_v14, 255.0 }
 0x1c2   :  { %v197_v17 = vcvt.f32.s32 %v142_v15  ;;  %v205_v18 = vcvt.f32.s32 %v143_v16  ;;  %v195_v20 = vand.u32 2147483647, %v142_v15  ;;  %v200_v23 = vand.u32 2147483648, %v142_v15 }
 0x1c3   :  { %v203_v24 = vand.u32 2147483647, %v143_v16  ;;  %v208_v0 = vand.u32 2147483648, %v143_v16 }
 0x1c4   :  { %v198_v19 = vcvt.s32.f32 %v197_v17  ;;  %v206_v21 = vcvt.s32.f32 %v205_v18  ;;  %vm196_vm3 = vcmp.lt.f32.partialorder %v195_v20, 8388608.0 }
 0x1c5   :  { %vm204_vm4 = vcmp.lt.f32.partialorder %v203_v24, 8388608.0 }
 0x1c6   :  { %v199_v22 = vand.u32 2147483647, %v198_v19  ;;  %v207_v25 = vand.u32 2147483647, %v206_v21 }
 0x1c8   :  { %v201_v26 = vor.u32 %v200_v23, %v199_v22  ;;  %v209_v1 = vor.u32 %v208_v0, %v207_v25 }
 0x1ca   :  { %v202_v27 = vsel %vm196_vm3, %v201_v26, %v142_v15  ;;  %v210_v28 = vsel %vm204_vm4, %v209_v1, %v143_v16 }
 0x1cb   :  { %v147_v29 = vmul.f32 %v202_v27, %v131_v6  ;;  %v148_v30 = vmul.f32 %v210_v28, %v131_v6 }
 0x1cd   :  { %v149_v31 = vadd.f32 %v147_v29, %v323_v4  ;;  %v150_v32 = vadd.f32 %v148_v30, %v323_v4 }
 0x1cf   :  { %151 = vst [vmem:[%s347_s1] sm:$0xff] %v149_v31  ;;  %152 = vst [vmem:[%s347_s1 + $0x8] sm:$0xff] %v150_v32 }
 0x1d0   :  { %261 = dma.done.wait [#allocation3], 16  }
 0x1d1   :  { %262 = vsyncadd [#allocation3], 4294967280 }
 0x1d2   :  { %263 = dma.done.wait [#allocation5], 16  }
 0x1d3   :  { %264 = vsyncadd [#allocation5], 4294967280 }
 0x1d4   :  { %187 = vsyncpa [#allocation3], 1 }
 0x1d5   :  { %188 = vsyncpa [#allocation5], 1 }

</bundles_post_ra>
